<compile_context>
chip_gen: v7x
topology: tpu7x:2x2x1
jax: 0.10.0
libtpu: 0.0.40
codegen_flags: <defaults>
</compile_context>

<pallas_src>
import jax
import jax.numpy as jnp
from jax.experimental import pallas as pl
from jax.experimental.pallas import tpu as pltpu


_LANE = 128
_SUBLANE = 16  # bf16 packs 16 rows per vreg; keep batch tiles a multiple of this


def _round_up(n, m):
    return ((n + m - 1) // m) * m


def _cdiv(a, b):
    return (a + b - 1) // b


def _multiclass_kernel(x_ref, w1_ref, b1_ref, wh_ref, bh_ref,
                       out_label_ref, out_auth_ref):
    # fc1: cast the unpadded f32 x tile to bf16 in-kernel (rides idle VPU slots),
    # MXU matmul with f32 accumulation; bias add + ReLU stay f32 (v5e-safe VPU).
    xb = x_ref[...].astype(w1_ref.dtype)
    h = jnp.dot(xb, w1_ref[...], preferred_element_type=jnp.float32)
    h = jnp.maximum(h + b1_ref[...], 0.0)
    # dropout: eval-mode identity (see header comment)

    # Fused heads: one 128-lane-padded matmul kept entirely in VMEM; only the
    # 5 real columns are written back, directly into the compact outputs.
    logits = jnp.dot(h.astype(wh_ref.dtype), wh_ref[...],
                     preferred_element_type=jnp.float32) + bh_ref[...]
    nl = out_label_ref.shape[-1]
    na = out_auth_ref.shape[-1]
    out_label_ref[...] = logits[:, :nl].astype(out_label_ref.dtype)
    out_auth_ref[...] = logits[:, nl:nl + na].astype(out_auth_ref.dtype)


def multiclass_forward(x, w1, b1, w_label, b_label, w_auth, b_auth,
                       *, tile_b_max=2048, use_bf16=True):
    """x: (B, D) f32. Weights stored transposed as (in, out). Biases (1, out)."""
    B, D = x.shape
    H = w1.shape[1]
    n_label = w_label.shape[1]
    n_auth = w_auth.shape[1]
    n_out = n_label + n_auth

    # Lane-full padding only for VMEM-resident weight dims (zeros -> exact).
    H_pad = _round_up(H, _LANE)
    O_pad = _round_up(n_out, _LANE)

    # Batch tile: aim for >=4 grid steps (megacore on v7x, pipeline overlap),
    # multiple of 16 (bf16 sublane packing), capped for VMEM headroom.
    tile_b = min(tile_b_max,
                 _round_up(_cdiv(B, 4), _SUBLANE),
                 _round_up(B, _SUBLANE))
    tile_b = max(tile_b, _SUBLANE)
    grid = (_cdiv(B, tile_b),)

    cdt = jnp.bfloat16 if use_bf16 else jnp.float32
    w_itemsize = 2 if use_bf16 else 4

    # Weights/biases are tiny: pad hidden/output dims to lane-full once, in the wrapper.
    w1_p = jnp.pad(w1, ((0, 0), (0, H_pad - H))).astype(cdt)
    b1_p = jnp.pad(b1, ((0, 0), (0, H_pad - H))).astype(jnp.float32)
    wh = jnp.concatenate([w_label, w_auth], axis=1)
    wh_p = jnp.pad(wh, ((0, H_pad - H), (0, O_pad - n_out))).astype(cdt)
    bh = jnp.concatenate([b_label, b_auth], axis=1)
    bh_p = jnp.pad(bh, ((0, 0), (0, O_pad - n_out))).astype(jnp.float32)

    cost = pl.CostEstimate(
        flops=2 * B * (D * H + H * n_out),
        transcendentals=0,
        bytes_accessed=(B * D * 4                       # x (f32, unpadded)
                        + D * H_pad * w_itemsize        # w1
                        + H_pad * O_pad * w_itemsize    # fused head W
                        + (H_pad + O_pad) * 4           # biases
                        + B * n_out * 4),               # compact outputs
    )

    out_label, out_auth = pl.pallas_call(
        _multiclass_kernel,
        out_shape=(jax.ShapeDtypeStruct((B, n_label), jnp.float32),
                   jax.ShapeDtypeStruct((B, n_auth), jnp.float32)),
        grid=grid,
        in_specs=[
            pl.BlockSpec((tile_b, D), lambda i: (i, 0)),     # x: batch-tiled, unpadded f32
            pl.BlockSpec((D, H_pad), lambda i: (0, 0)),      # w1: VMEM-resident
            pl.BlockSpec((1, H_pad), lambda i: (0, 0)),      # b1: VMEM-resident
            pl.BlockSpec((H_pad, O_pad), lambda i: (0, 0)),  # fused head W: resident
            pl.BlockSpec((1, O_pad), lambda i: (0, 0)),      # fused head b: resident
        ],
        out_specs=[
            pl.BlockSpec((tile_b, n_label), lambda i: (i, 0)),  # compact (B,3) writeback
            pl.BlockSpec((tile_b, n_auth), lambda i: (i, 0)),   # compact (B,2) writeback
        ],
        compiler_params=pltpu.CompilerParams(
            dimension_semantics=("parallel",),
            vmem_limit_bytes=32 * 1024 * 1024),
        cost_estimate=cost,
    )(x, w1_p, b1_p, wh_p, bh_p)

    return out_label, out_auth


def init_params(key, input_dim, hidden=128, n_label=3, n_auth=2):
    """Deterministic synthetic init (uniform fan-in scaling, like torch Linear)."""
    ks = jax.random.split(key, 6)

    def linear(kw, kb, fan_in, fan_out):
        bound = 1.0 / jnp.sqrt(jnp.asarray(fan_in, jnp.float32))
        # stored as (in, out) == transpose of torch's (out, in)
        w = jax.random.uniform(kw, (fan_in, fan_out), jnp.float32, -bound, bound)
        b = jax.random.uniform(kb, (1, fan_out), jnp.float32, -bound, bound)
        return w, b

    w1, b1 = linear(ks[0], ks[1], input_dim, hidden)
    wl, bl = linear(ks[2], ks[3], hidden, n_label)
    wa, ba = linear(ks[4], ks[5], hidden, n_auth)
    return w1, b1, wl, bl, wa, ba


if __name__ == "__main__":
    key = jax.random.PRNGKey(0)
    k_x, k_p = jax.random.split(key)

    batch, input_dim = 8, 32
    x = jax.random.normal(k_x, (batch, input_dim), jnp.float32)
    params = init_params(k_p, input_dim)

    logits_label, logits_auth = jax.jit(multiclass_forward)(x, *params)
    jax.block_until_ready((logits_label, logits_auth))

    # Reference with matching bf16 operands + f32 accumulation (eval dropout = identity).
    w1, b1, wl, bl, wa, ba = params
    xb = x.astype(jnp.bfloat16)
    h = jnp.maximum(
        jnp.dot(xb, w1.astype(jnp.bfloat16), preferred_element_type=jnp.float32) + b1,
        0.0)
    hb = h.astype(jnp.bfloat16)
    ref_label = jnp.dot(hb, wl.astype(jnp.bfloat16),
                        preferred_element_type=jnp.float32) + bl
    ref_auth = jnp.dot(hb, wa.astype(jnp.bfloat16),
                       preferred_element_type=jnp.float32) + ba

    assert logits_label.shape == (batch, 3)
    assert logits_auth.shape == (batch, 2)
    assert jnp.allclose(logits_label, ref_label, atol=1e-2, rtol=1e-2)
    assert jnp.allclose(logits_auth, ref_auth, atol=1e-2, rtol=1e-2)

    print("KERNEL_OK")
</pallas_src>

<mosaic_0001>
module attributes {stable_mosaic.version = 11 : i64} {
  func.func @_multiclass_kernel(%arg0: i32, %arg1: memref<16x32xf32, #tpu.memory_space<vmem>>, %arg2: memref<32x128xbf16, #tpu.memory_space<vmem>>, %arg3: memref<1x128xf32, #tpu.memory_space<vmem>>, %arg4: memref<128x128xbf16, #tpu.memory_space<vmem>>, %arg5: memref<1x128xf32, #tpu.memory_space<vmem>>, %arg6: memref<16x3xf32, #tpu.memory_space<vmem>>, %arg7: memref<16x2xf32, #tpu.memory_space<vmem>>) attributes {dimension_semantics = [#tpu.dimension_semantics<parallel>], iteration_bounds = array<i64: 1>, scalar_prefetch = 0 : i64, scratch_operands = 0 : i64, tpu.core_type = #tpu.core_type<tc>, window_params = [{transform_indices = @transform_0, window_bounds = array<i64: 16, 32>}, {pipeline_mode = #tpu.pipeline_mode<synchronous>, transform_indices = @transform_1, window_bounds = array<i64: 32, 128>}, {pipeline_mode = #tpu.pipeline_mode<synchronous>, transform_indices = @transform_2, window_bounds = array<i64: 1, 128>}, {pipeline_mode = #tpu.pipeline_mode<synchronous>, transform_indices = @transform_3, window_bounds = array<i64: 128, 128>}, {pipeline_mode = #tpu.pipeline_mode<synchronous>, transform_indices = @transform_4, window_bounds = array<i64: 1, 128>}, {transform_indices = @transform_5, window_bounds = array<i64: 16, 3>}, {transform_indices = @transform_6, window_bounds = array<i64: 16, 2>}]} {
    %c0 = arith.constant 0 : index
    %c0_0 = arith.constant 0 : index
    %0 = vector.load %arg1[%c0, %c0_0] : memref<16x32xf32, #tpu.memory_space<vmem>>, vector<16x32xf32>
    %1 = arith.truncf %0 : vector<16x32xf32> to vector<16x32xbf16>
    %c0_1 = arith.constant 0 : index
    %c0_2 = arith.constant 0 : index
    %2 = vector.load %arg2[%c0_1, %c0_2] : memref<32x128xbf16, #tpu.memory_space<vmem>>, vector<32x128xbf16>
    %cst = arith.constant dense<0.000000e+00> : vector<16x128xf32>
    %3 = tpu.matmul %1, %2, %cst {dimension_numbers = #tpu.dot_dimension_numbers<[1], [0], [0], [1], [0, 0, 1, 1], [], []>} : vector<16x32xbf16>, vector<32x128xbf16>, vector<16x128xf32> -> vector<16x128xf32>
    %c0_3 = arith.constant 0 : index
    %c0_4 = arith.constant 0 : index
    %4 = vector.load %arg3[%c0_3, %c0_4] : memref<1x128xf32, #tpu.memory_space<vmem>>, vector<1x128xf32>
    %5 = vector.broadcast %4 : vector<1x128xf32> to vector<16x128xf32>
    %6 = arith.addf %3, %5 : vector<16x128xf32>
    %cst_5 = arith.constant 0.000000e+00 : f32
    %7 = vector.broadcast %cst_5 : f32 to vector<16x128xf32>
    %8 = arith.maximumf %6, %7 : vector<16x128xf32>
    %9 = arith.truncf %8 : vector<16x128xf32> to vector<16x128xbf16>
    %c0_6 = arith.constant 0 : index
    %c0_7 = arith.constant 0 : index
    %10 = vector.load %arg4[%c0_6, %c0_7] : memref<128x128xbf16, #tpu.memory_space<vmem>>, vector<128x128xbf16>
    %cst_8 = arith.constant dense<0.000000e+00> : vector<16x128xf32>
    %11 = tpu.matmul %9, %10, %cst_8 {dimension_numbers = #tpu.dot_dimension_numbers<[1], [0], [0], [1], [0, 0, 1, 1], [], []>} : vector<16x128xbf16>, vector<128x128xbf16>, vector<16x128xf32> -> vector<16x128xf32>
    %c0_9 = arith.constant 0 : index
    %c0_10 = arith.constant 0 : index
    %12 = vector.load %arg5[%c0_9, %c0_10] : memref<1x128xf32, #tpu.memory_space<vmem>>, vector<1x128xf32>
    %13 = vector.broadcast %12 : vector<1x128xf32> to vector<16x128xf32>
    %14 = arith.addf %11, %13 : vector<16x128xf32>
    %15 = vector.extract_strided_slice %14 {offsets = [0, 0], sizes = [16, 3], strides = [1, 1]} : vector<16x128xf32> to vector<16x3xf32>
    %c0_11 = arith.constant 0 : index
    %c0_12 = arith.constant 0 : index
    %16 = vector.load %arg6[%c0_11, %c0_12] : memref<16x3xf32, #tpu.memory_space<vmem>>, vector<16x3xf32>
    tpu.vector_store %arg6[%c0_11, %c0_12], %15 {strides = array<i32>} : memref<16x3xf32, #tpu.memory_space<vmem>>, vector<16x3xf32>,
    %17 = vector.extract_strided_slice %14 {offsets = [0, 3], sizes = [16, 2], strides = [1, 1]} : vector<16x128xf32> to vector<16x2xf32>
    %c0_13 = arith.constant 0 : index
    %c0_14 = arith.constant 0 : index
    %18 = vector.load %arg7[%c0_13, %c0_14] : memref<16x2xf32, #tpu.memory_space<vmem>>, vector<16x2xf32>
    tpu.vector_store %arg7[%c0_13, %c0_14], %17 {strides = array<i32>} : memref<16x2xf32, #tpu.memory_space<vmem>>, vector<16x2xf32>,
    return
  }
  func.func @transform_0(%arg0: i32) -> (i32, i32) {
    %c0_i32 = arith.constant 0 : i32
    %c0_i32_0 = arith.constant 0 : i32
    return %arg0, %c0_i32 : i32, i32
  }
  func.func @transform_1(%arg0: i32) -> (i32, i32) {
    %c0_i32 = arith.constant 0 : i32
    %c0_i32_0 = arith.constant 0 : i32
    %c0_i32_1 = arith.constant 0 : i32
    return %c0_i32, %c0_i32_0 : i32, i32
  }
  func.func @transform_2(%arg0: i32) -> (i32, i32) {
    %c0_i32 = arith.constant 0 : i32
    %c0_i32_0 = arith.constant 0 : i32
    %c0_i32_1 = arith.constant 0 : i32
    return %c0_i32, %c0_i32_0 : i32, i32
  }
  func.func @transform_3(%arg0: i32) -> (i32, i32) {
    %c0_i32 = arith.constant 0 : i32
    %c0_i32_0 = arith.constant 0 : i32
    %c0_i32_1 = arith.constant 0 : i32
    return %c0_i32, %c0_i32_0 : i32, i32
  }
  func.func @transform_4(%arg0: i32) -> (i32, i32) {
    %c0_i32 = arith.constant 0 : i32
    %c0_i32_0 = arith.constant 0 : i32
    %c0_i32_1 = arith.constant 0 : i32
    return %c0_i32, %c0_i32_0 : i32, i32
  }
  func.func @transform_5(%arg0: i32) -> (i32, i32) {
    %c0_i32 = arith.constant 0 : i32
    %c0_i32_0 = arith.constant 0 : i32
    return %arg0, %c0_i32 : i32, i32
  }
  func.func @transform_6(%arg0: i32) -> (i32, i32) {
    %c0_i32 = arith.constant 0 : i32
    %c0_i32_0 = arith.constant 0 : i32
    return %arg0, %c0_i32 : i32, i32
  }
}

</mosaic_0001>

<bundles_post_ra>
// kernel: multiclass_forward.1
= control target key start
LH: loop header
LB: loop body
LE: loop exit
PB: predicated region body
PF: predicated region fallthrough
CT: control target
= control target key end

     0   :  { %v369_v1 = vmov 0.0   ;;  %vm370_vm0 = vmmov 0   ;;  %vm49_vm1 = vcmask 261120   ;;  %vm209_vm2 = vcmask 23552   ;;  %s455_s0 = inlined_call_operand.vmem [shape: f32[8,32], index: 0, kind: input, shape index: {}]   ;;  %s456_s1 = inlined_call_operand.vmem [shape: bf16[32,128], index: 1, kind: input, shape index: {}]   ;;  %s457_s2 = inlined_call_operand.vmem [shape: f32[1,128], index: 2, kind: input, shape index: {}]   ;;  %s458_s3 = inlined_call_operand.vmem [shape: bf16[128,128], index: 3, kind: input, shape index: {}]   ;;  %s459_s4 = inlined_call_operand.vmem [shape: f32[1,128], index: 4, kind: input, shape index: {}]   ;;  %s460_s5 = inlined_call_operand.vmem [shape: f32[8,3], index: 5, kind: output, shape index: {0}]   ;;  %s461_s6 = inlined_call_operand.vmem [shape: f32[8,2], index: 6, kind: output, shape index: {1}]  }
   0x1   :  { %v359_v0 = vld [vmem:[%s456_s1] sm:$0xff]   ;;  %328 = vmatprep.subr.bf16.mxu0 %v369_v1  ;;  %v360_v2 = vld [vmem:[%s456_s1 + $0x8] sm:$0xff]   ;;  %336 = vmatprep.subr.bf16.mxu1 %v369_v1  ;;  %v363_v8 = vld [vmem:[%s458_s3 + $0x10] sm:$0xff]   ;;  %vm220_vm3 = vcmask 15360  }
   0x2   :  { %329 = vmatpush3.bf16.msra.mxu0 %v359_v0  ;;  %332 = vmatprep.mubr.msk.bf16.mxu0 %vm370_vm0, %v369_v1  ;;  %v23_v3 = vld [vmem:[%s455_s0] sm:$0xff]  ;;  %v24_v4 = vld [vmem:[%s455_s0 + $0x8] sm:$0xff]  ;;  %v364_v9 = vld [vmem:[%s458_s3 + $0x18] sm:$0xff]  }
   0x3   :  { %330 = vmatprep.subr.bf16.mxu0 %v369_v1  ;;  %v361_v5 = vld [vmem:[%s458_s3] sm:$0xff]   ;;  %352 = vmatprep.mubr.msk.bf16.mxu1 %vm370_vm0, %v369_v1  ;;  %v25_v6 = vpack.c.bf16 %v24_v4, %v23_v3  ;;  %v362_v7 = vld [vmem:[%s458_s3 + $0x8] sm:$0xff]   ;;  %v367_v12 = vld [vmem:[%s458_s3 + $0x30] sm:$0xff]  }
   0x4   :  { %337 = vmatpush3.bf16.msra.mxu1 %v361_v5  ;;  %v365_v10 = vld [vmem:[%s458_s3 + $0x20] sm:$0xff]   ;;  %v366_v11 = vld [vmem:[%s458_s3 + $0x28] sm:$0xff]   ;;  %v368_v13 = vld [vmem:[%s458_s3 + $0x38] sm:$0xff]  }
   0x5   :  { %338 = vmatprep.subr.bf16.mxu1 %v369_v1  ;;  %v303_v14 = vld [vmem:[%s457_s2] ss:$0 sm:$0xff]  ;;  %s371_s2 = smov 125  }
   0x6   :  { %331 = vmatpush3.bf16.msra.mxu0 %v360_v2  ;;  %v307_v24 = vld [vmem:[%s459_s4] ss:$0 sm:$0xff] }
   0x8   :  { %339 = vmatpush3.bf16.msra.mxu1 %v362_v7 }
   0x9   :  { %333 = vmatmul.mubr.msk.bf16.vlgmr.msra.gmra.mrb[0].mxu0 %vm49_vm1, %v25_v6  ;;  %340 = vmatprep.subr.bf16.mxu1 %v369_v1 }
   0xc   :  { %341 = vmatpush3.bf16.msra.mxu1 %v363_v8 }
   0xd   :  { %342 = vmatprep.subr.bf16.mxu1 %v369_v1 }
  0x10   :  { %343 = vmatpush3.bf16.msra.mxu1 %v364_v9 }
  0x11   :  { %344 = vmatprep.subr.bf16.mxu1 %v369_v1 }
  0x14   :  { %345 = vmatpush3.bf16.msra.mxu1 %v365_v10 }
  0x15   :  { %346 = vmatprep.subr.bf16.mxu1 %v369_v1 }
  0x18   :  { %347 = vmatpush3.bf16.msra.mxu1 %v366_v11 }
  0x19   :  { %348 = vmatprep.subr.bf16.mxu1 %v369_v1 }
  0x1c   :  { %349 = vmatpush3.bf16.msra.mxu1 %v367_v12 }
  0x1d   :  { %350 = vmatprep.subr.bf16.mxu1 %v369_v1 }
  0x20   :  { %351 = vmatpush3.bf16.msra.mxu1 %v368_v13 }
  0xdc   :  { %v87_v15 = vpop.f32.mrb[0].mxu0 }
  0xdd   :  { %v88_v16 = vadd.f32 %v303_v14, %v87_v15  ;;  %v334_v17 = vpop.f32.mrb[1].mxu0 }
  0xde   :  { %v90_v18 = vpop.f32.mrb[2].mxu0 }
  0xdf   :  { %v91_v19 = vadd.f32 %v303_v14, %v90_v18  ;;  %v335_v20 = vpop.f32.mrb[3].mxu0  ;;  %v94_v21 = vmax.f32 %v88_v16, 0.0 }
  0xe1   :  { %v95_v22 = vmax.f32 %v91_v19, 0.0 }
  0xe3   :  { %v96_v23 = vpack.c.bf16 %v95_v22, %v94_v21 }
  0xe5   :  { %353 = vmatmul.mubr.bf16.vlgmr.msra.gmra.mrb[0].mxu1 %v96_v23 }
 0x1b8   :  { %v202_v25 = vpop.f32.mrb[0].mxu1 }
 0x1b9   :  { %v203_v26 = vadd.f32 %v307_v24, %v202_v25  ;;  %v354_v27 = vpop.f32.mrb[1].mxu1 }
 0x1ba   :  { %v205_v28 = vpop.f32.mrb[2].mxu1 }
 0x1bb   :  { %210 = vst.msk [vmem:[#allocation2] sm:$0xff] %vm209_vm2, %v203_v26  ;;  %v206_v29 = vadd.f32 %v307_v24, %v205_v28  ;;  %214 = vrot.lane.b32.xlu0 %v203_v26, %s371_s2  ;;  %v355_v30 = vpop.f32.mrb[3].mxu1 }
 0x1bf   :  { %216 = vrot.lane.b32.xlu0 %v206_v29, %s371_s2 }
 0x1c2   :  { %v252_v31 = vld [vmem:[#allocation2] sm:$0xff] }
 0x1c3   :  { %253 = vst [vmem:[%s460_s5] sm:$0xff] %v252_v31 }
 0x22d   :  { %v215_v32 = vpop.permute.xlu0 %214 }
 0x22e   :  { %221 = vst.msk [vmem:[#allocation3] sm:$0xff] %vm220_vm3, %v215_v32 }
 0x231   :  { %v217_v33 = vpop.permute.xlu0 %216 }
 0x235   :  { %v286_v34 = vld [vmem:[#allocation3] sm:$0xff] }
 0x236   :  { %287 = vst [vmem:[%s461_s6] sm:$0xff] %v286_v34 }

</bundles_post_ra>
